<compile_context>
chip_gen: v7x
topology: tpu7x:2x2x1
jax: 0.10.0
libtpu: 0.0.40
codegen_flags: <defaults>
</compile_context>

<pallas_src>
import functools

import jax
import jax.numpy as jnp
from jax.experimental import pallas as pl
from jax.experimental.pallas import tpu as pltpu


ENTROPY_LOSS_WEIGHT = 0.1


def _round_up(a, b):
    return ((a + b - 1) // b) * b


def _dial_entropy_loss_kernel(y_ref, xs_ref, xt_ref, out_ref, *,
                              half, tile_rows, weight):
    # y_ref  : (T, 1) int32 labels for the source rows of this tile
    # xs_ref : (T, C) source-half logits tile (native dtype)
    # xt_ref : (T, C) target-half logits tile (native dtype)
    # out_ref: (1, 1) f32 SMEM per-tile partial sum of ce + w*en (un-normalized)
    i = pl.program_id(0)

    xs = xs_ref[...].astype(jnp.float32)          # (T, C)
    xt = xt_ref[...].astype(jnp.float32)          # (T, C)
    labels = y_ref[...]                           # (T, 1) int32
    T, C = xs.shape

    # Row-validity mask for the (possibly ragged) last tile.  Garbage rows may
    # produce NaN/Inf; jnp.where (select) discards them without propagation.
    row_ids = jax.lax.broadcasted_iota(jnp.int32, (T, 1), 0)
    valid = (i * tile_rows + row_ids) < half      # (T, 1) bool

    # ---- CrossEntropyLoss(xs, y): sum_i ( lse_i - z_i[y_i] ) ----
    m_s = jnp.max(xs, axis=-1, keepdims=True)
    z_s = xs - m_s
    lse_s = jnp.log(jnp.sum(jnp.exp(z_s), axis=-1, keepdims=True))   # (T, 1)
    cls_ids = jax.lax.broadcasted_iota(jnp.int32, (T, C), 1)
    picked = jnp.sum(jnp.where(cls_ids == labels, z_s, 0.0),
                     axis=-1, keepdims=True)                         # (T, 1)
    ce_row = lse_s - picked                                          # (T, 1)
    ce_sum = jnp.sum(jnp.where(valid, ce_row, 0.0))

    # ---- EntropyLoss(xt): sum_i ( log(s_i) - (sum_c e*z)/s_i ) ----
    m_t = jnp.max(xt, axis=-1, keepdims=True)
    z_t = xt - m_t
    e_t = jnp.exp(z_t)
    s_t = jnp.sum(e_t, axis=-1, keepdims=True)                       # (T, 1)
    ez = jnp.sum(e_t * z_t, axis=-1, keepdims=True)                  # (T, 1)
    en_row = jnp.log(s_t) - ez * pl.reciprocal(s_t)                  # (T, 1)
    en_sum = jnp.sum(jnp.where(valid, en_row, 0.0))

    out_ref[0, 0] = ce_sum + jnp.float32(weight) * en_sum


def _compute_tile_rows(half, C, itemsize, vmem_limit, override=None):
    # Sublane packing: f32 -> 8 rows, bf16 -> 16, int8/fp8 -> 32.
    pack = max(8, 32 // itemsize)
    if override is not None:
        tr = max(pack, _round_up(int(override), pack))
    else:
        # Per-row resident bytes: 2 inputs x 2 double-buffers of native dtype
        # plus ~6 f32-tile-sized in-kernel temporaries (casts, exp, products).
        bytes_per_row = 4 * C * itemsize + 24 * C + 16
        tr = vmem_limit // max(1, bytes_per_row)
        tr = max(pack, (tr // pack) * pack)
        tr = min(tr, 32768)
    if half <= tr:
        tr = half          # full-extent block (allowed even if not 8-aligned)
    return tr


def dial_entropy_loss(x, y, entropy_loss_weight=ENTROPY_LOSS_WEIGHT,
                      tile_rows=None):
    """Training-mode DIALEntropyLoss.

    x: (N, C) float logits (N even; rows [:N//2] are 'source', [N//2:] 'target')
    y: (N//2,) int labels for the source half
    returns: scalar float32 loss
    """
    N, C = x.shape
    assert N % 2 == 0, "DIALEntropyLoss (training) needs an even batch"
    half = N // 2

    # Free row-major reshape: no HBM copy.  The same buffer is passed as both
    # the xs and xt operands; BlockSpecs select the half via the leading dim.
    x3 = x.reshape(2, half, C)
    y2 = y.astype(jnp.int32).reshape(half, 1)
    itemsize = jnp.dtype(x.dtype).itemsize

    # Per-generation VMEM budget: 3/4 of physical capacity, capped at 96 MiB
    # (v5e/v6e: 96 MiB of 128; v7x: 48 MiB of 64).  Fallback is v7x-safe.
    try:
        vmem_cap = int(getattr(pltpu.get_tpu_info(), "vmem_capacity_bytes",
                               64 << 20))
    except Exception:
        vmem_cap = 64 << 20
    vmem_limit = min((vmem_cap * 3) // 4, 96 << 20)

    tr = _compute_tile_rows(half, C, itemsize, vmem_limit, tile_rows)
    num_tiles = pl.cdiv(half, tr)

    kernel = functools.partial(
        _dial_entropy_loss_kernel,
        half=half, tile_rows=tr, weight=float(entropy_loss_weight))

    cost = pl.CostEstimate(
        flops=10 * N * C,
        transcendentals=2 * N * C,
        bytes_accessed=N * C * itemsize + half * 4 + num_tiles * 4,
    )

    partials = pl.pallas_call(
        kernel,
        out_shape=jax.ShapeDtypeStruct((num_tiles, 1), jnp.float32),
        grid_spec=pltpu.PrefetchScalarGridSpec(
            num_scalar_prefetch=0,
            grid=(num_tiles,),
            in_specs=[
                # labels strip
                pl.BlockSpec((tr, 1), lambda i: (i, 0)),
                # source-half tile: rows [i*tr, (i+1)*tr) of x3[0]
                pl.BlockSpec((pl.Squeezed(), tr, C), lambda i: (0, i, 0)),
                # target-half tile: rows [i*tr, (i+1)*tr) of x3[1]
                pl.BlockSpec((pl.Squeezed(), tr, C), lambda i: (1, i, 0)),
            ],
            # Per-tile partial sums -> no shared accumulator -> parallel axis.
            out_specs=pl.BlockSpec((1, 1), lambda i: (i, 0),
                                   memory_space=pltpu.SMEM),
        ),
        compiler_params=pltpu.CompilerParams(
            dimension_semantics=("parallel",),
            vmem_limit_bytes=int(vmem_limit)),
        cost_estimate=cost,
    )(y2, x3, x3)

    return jnp.sum(partials) * jnp.float32(1.0 / half)


def _reference(x, y, w=ENTROPY_LOSS_WEIGHT):
    # Pure-JAX reference matching the PyTorch training-mode semantics.
    N, C = x.shape
    half = N // 2
    xs, xt = x[:half], x[half:]
    logp_s = jax.nn.log_softmax(xs.astype(jnp.float32), axis=-1)
    ce = -jnp.mean(logp_s[jnp.arange(half), y])
    p_t = jax.nn.softmax(xt.astype(jnp.float32), axis=-1)
    logp_t = jax.nn.log_softmax(xt.astype(jnp.float32), axis=-1)
    en = -jnp.mean(jnp.sum(p_t * logp_t, axis=-1))
    return ce + w * en


if __name__ == "__main__":
    key = jax.random.PRNGKey(0)
    kx, ky = jax.random.split(key)

    # Small demo: N=8 rows (4 source + 4 target), C=16 classes -> single tile.
    N, C = 8, 16
    x = jax.random.normal(kx, (N, C), dtype=jnp.float32)
    y = jax.random.randint(ky, (N // 2,), 0, C, dtype=jnp.int32)

    loss = jax.block_until_ready(dial_entropy_loss(x, y))
    ref = _reference(x, y)
    assert jnp.allclose(loss, ref, atol=1e-5, rtol=1e-5), (loss, ref)

    # Exercise the multi-tile + ragged-last-block path (forced small tile):
    # half=20 rows, tile_rows=8 -> 3 tiles, last tile ragged/masked.
    N2, C2 = 40, 24
    xb = jax.random.normal(kx, (N2, C2), dtype=jnp.float32)
    yb = jax.random.randint(ky, (N2 // 2,), 0, C2, dtype=jnp.int32)
    loss2 = jax.block_until_ready(dial_entropy_loss(xb, yb, tile_rows=8))
    ref2 = _reference(xb, yb)
    assert jnp.allclose(loss2, ref2, atol=1e-5, rtol=1e-5), (loss2, ref2)

    print("KERNEL_OK")
</pallas_src>

<mosaic_0001>
module attributes {stable_mosaic.version = 11 : i64} {
  func.func @_dial_entropy_loss_kernel(%arg0: i32, %arg1: memref<4x1xi32, #tpu.memory_space<vmem>>, %arg2: memref<1x4x16xf32, #tpu.memory_space<vmem>>, %arg3: memref<1x4x16xf32, #tpu.memory_space<vmem>>, %arg4: memref<1x1xf32, #tpu.memory_space<smem>>) attributes {dimension_semantics = [#tpu.dimension_semantics<parallel>], iteration_bounds = array<i64: 1>, scalar_prefetch = 0 : i64, scratch_operands = 0 : i64, tpu.core_type = #tpu.core_type<tc>, window_params = [{transform_indices = @transform_0, window_bounds = array<i64: 4, 1>}, {transform_indices = @transform_1, window_bounds = array<i64: 1, 4, 16>}, {transform_indices = @transform_2, window_bounds = array<i64: 1, 4, 16>}, {transform_indices = @transform_3, window_bounds = array<i64: 1, 1>}]} {
    %c0 = arith.constant 0 : index
    %c0_0 = arith.constant 0 : index
    %c0_1 = arith.constant 0 : index
    %0 = vector.load %arg2[%c0, %c0_0, %c0_1] : memref<1x4x16xf32, #tpu.memory_space<vmem>>, vector<1x4x16xf32>
    %1 = vector.shape_cast %0 : vector<1x4x16xf32> to vector<4x16xf32>
    %c0_2 = arith.constant 0 : index
    %c0_3 = arith.constant 0 : index
    %c0_4 = arith.constant 0 : index
    %2 = vector.load %arg3[%c0_2, %c0_3, %c0_4] : memref<1x4x16xf32, #tpu.memory_space<vmem>>, vector<1x4x16xf32>
    %3 = vector.shape_cast %2 : vector<1x4x16xf32> to vector<4x16xf32>
    %c0_5 = arith.constant 0 : index
    %c0_6 = arith.constant 0 : index
    %4 = vector.load %arg1[%c0_5, %c0_6] : memref<4x1xi32, #tpu.memory_space<vmem>>, vector<4x1xi32>
    %5 = tpu.iota {dimensions = array<i32: 0>} : vector<4x1xi32>
    %c4_i32 = arith.constant 4 : i32
    %6 = arith.muli %arg0, %c4_i32 : i32
    %7 = vector.broadcast %6 : i32 to vector<4x1xi32>
    %8 = arith.addi %7, %5 : vector<4x1xi32>
    %c4_i32_7 = arith.constant 4 : i32
    %9 = vector.broadcast %c4_i32_7 : i32 to vector<4x1xi32>
    %10 = arith.cmpi slt, %8, %9 : vector<4x1xi32>
    %cst = arith.constant dense<0xFF800000> : vector<4xf32>
    %11 = vector.multi_reduction <maximumf>, %1, %cst [1] : vector<4x16xf32> to vector<4xf32>
    %12 = vector.shape_cast %11 : vector<4xf32> to vector<4x1xf32>
    %13 = vector.broadcast %12 : vector<4x1xf32> to vector<4x16xf32>
    %14 = arith.subf %1, %13 : vector<4x16xf32>
    %15 = math.exp %14 : vector<4x16xf32>
    %cst_8 = arith.constant dense<0.000000e+00> : vector<4xf32>
    %16 = vector.multi_reduction <add>, %15, %cst_8 [1] : vector<4x16xf32> to vector<4xf32>
    %17 = vector.shape_cast %16 : vector<4xf32> to vector<4x1xf32>
    %18 = math.log %17 : vector<4x1xf32>
    %19 = tpu.iota {dimensions = array<i32: 1>} : vector<4x16xi32>
    %20 = vector.broadcast %4 : vector<4x1xi32> to vector<4x16xi32>
    %21 = arith.cmpi eq, %19, %20 : vector<4x16xi32>
    %cst_9 = arith.constant 0.000000e+00 : f32
    %22 = vector.broadcast %cst_9 : f32 to vector<4x16xf32>
    %23 = arith.select %21, %14, %22 : vector<4x16xi1>, vector<4x16xf32>
    %cst_10 = arith.constant dense<0.000000e+00> : vector<4xf32>
    %24 = vector.multi_reduction <add>, %23, %cst_10 [1] : vector<4x16xf32> to vector<4xf32>
    %25 = vector.shape_cast %24 : vector<4xf32> to vector<4x1xf32>
    %26 = arith.subf %18, %25 : vector<4x1xf32>
    %cst_11 = arith.constant 0.000000e+00 : f32
    %27 = vector.broadcast %cst_11 : f32 to vector<4x1xf32>
    %28 = arith.select %10, %26, %27 : vector<4x1xi1>, vector<4x1xf32>
    %29 = vector.shape_cast %28 : vector<4x1xf32> to vector<1x4x1xf32>
    %cst_12 = arith.constant dense<0.000000e+00> : vector<1xf32>
    %30 = vector.multi_reduction <add>, %29, %cst_12 [1, 2] : vector<1x4x1xf32> to vector<1xf32>
    %31 = vector.shape_cast %30 : vector<1xf32> to vector<1x1x1xf32>
    %32 = vector.extract %31[0, 0, 0] : f32 from vector<1x1x1xf32>
    %cst_13 = arith.constant dense<0xFF800000> : vector<4xf32>
    %33 = vector.multi_reduction <maximumf>, %3, %cst_13 [1] : vector<4x16xf32> to vector<4xf32>
    %34 = vector.shape_cast %33 : vector<4xf32> to vector<4x1xf32>
    %35 = vector.broadcast %34 : vector<4x1xf32> to vector<4x16xf32>
    %36 = arith.subf %3, %35 : vector<4x16xf32>
    %37 = math.exp %36 : vector<4x16xf32>
    %cst_14 = arith.constant dense<0.000000e+00> : vector<4xf32>
    %38 = vector.multi_reduction <add>, %37, %cst_14 [1] : vector<4x16xf32> to vector<4xf32>
    %39 = vector.shape_cast %38 : vector<4xf32> to vector<4x1xf32>
    %40 = arith.mulf %37, %36 : vector<4x16xf32>
    %cst_15 = arith.constant dense<0.000000e+00> : vector<4xf32>
    %41 = vector.multi_reduction <add>, %40, %cst_15 [1] : vector<4x16xf32> to vector<4xf32>
    %42 = vector.shape_cast %41 : vector<4xf32> to vector<4x1xf32>
    %43 = math.log %39 : vector<4x1xf32>
    %44 = tpu.reciprocal %39 : vector<4x1xf32> -> vector<4x1xf32>
    %45 = arith.mulf %42, %44 : vector<4x1xf32>
    %46 = arith.subf %43, %45 : vector<4x1xf32>
    %cst_16 = arith.constant 0.000000e+00 : f32
    %47 = vector.broadcast %cst_16 : f32 to vector<4x1xf32>
    %48 = arith.select %10, %46, %47 : vector<4x1xi1>, vector<4x1xf32>
    %49 = vector.shape_cast %48 : vector<4x1xf32> to vector<1x4x1xf32>
    %cst_17 = arith.constant dense<0.000000e+00> : vector<1xf32>
    %50 = vector.multi_reduction <add>, %49, %cst_17 [1, 2] : vector<1x4x1xf32> to vector<1xf32>
    %51 = vector.shape_cast %50 : vector<1xf32> to vector<1x1x1xf32>
    %52 = vector.extract %51[0, 0, 0] : f32 from vector<1x1x1xf32>
    %cst_18 = arith.constant 1.000000e-01 : f32
    %53 = arith.mulf %cst_18, %52 : f32
    %54 = arith.addf %32, %53 : f32
    %c0_19 = arith.constant 0 : index
    %c0_20 = arith.constant 0 : index
    %55 = memref.load %arg4[%c0_19, %c0_20] : memref<1x1xf32, #tpu.memory_space<smem>>
    memref.store %54, %arg4[%c0_19, %c0_20] : memref<1x1xf32, #tpu.memory_space<smem>>
    return
  }
  func.func @transform_0(%arg0: i32) -> (i32, i32) {
    %c0_i32 = arith.constant 0 : i32
    %c0_i32_0 = arith.constant 0 : i32
    return %arg0, %c0_i32 : i32, i32
  }
  func.func @transform_1(%arg0: i32) -> (i32, i32, i32) {
    %c0_i32 = arith.constant 0 : i32
    %c0_i32_0 = arith.constant 0 : i32
    %c0_i32_1 = arith.constant 0 : i32
    return %c0_i32, %arg0, %c0_i32_0 : i32, i32, i32
  }
  func.func @transform_2(%arg0: i32) -> (i32, i32, i32) {
    %c1_i32 = arith.constant 1 : i32
    %c0_i32 = arith.constant 0 : i32
    %c0_i32_0 = arith.constant 0 : i32
    return %c1_i32, %arg0, %c0_i32 : i32, i32, i32
  }
  func.func @transform_3(%arg0: i32) -> (i32, i32) {
    %c0_i32 = arith.constant 0 : i32
    %c0_i32_0 = arith.constant 0 : i32
    return %arg0, %c0_i32 : i32, i32
  }
}

</mosaic_0001>

<bundles_post_ra>
// kernel: tpu_custom_call.1
= control target key start
LH: loop header
LB: loop body
LE: loop exit
PB: predicated region body
PF: predicated region fallthrough
CT: control target
= control target key end

     0   :  { %8 = vsyncpa [#allocation3], 0  ;;  %s233_s0 = inlined_call_operand.vmem [shape: s32[4,1], index: 0, kind: input, shape index: {}]   ;;  %s234_s1 = inlined_call_operand.vmem [shape: f32[2,4,16], index: 1, kind: input, shape index: {}]   ;;  %s235_s2 = inlined_call_operand.hbm [shape: f32[2,4,16], index: 2, kind: input, shape index: {}]   ;;  %s236_s3 = inlined_call_operand.hbm [shape: f32[1,1], index: 3, kind: output, shape index: {}]  }
   0x1   :  { %9 = vsyncpa [#allocation4], 0  ;;  %s19_s14 = scalar_lea.hbm %s235_s2, 64  ;;  %s177_s15 = smov [#allocation2]  }
   0x2   :  { %s21_s16 = sshll.u32 %s177_s15, 4  ;;  %s162_s19 = scalar_lea.hbm %s235_s2, 128  ;;  %s22_s16 = int_to_ptr.vmem [resolvable:$true] %s21_s16 }
   0x3   :  { %p139_p0 = scmp.ne.s32.totalorder %s19_s14, %s162_s19  ;;  %p141_p1 = scmp.lt.u32.totalorder %s19_s14, %s235_s2 }
   0x4   :  { %p142_p2 = scmp.lt.u32.totalorder %s162_s19, %s162_s19  ;;  %p144_p4 = scmp.lt.u32.totalorder %s162_s19, %s19_s14 }
   0x6   :  { %p143_p3 = por %p142_p2, %p141_p1 }
   0x8   :  { %p145_p5 = por %p144_p4, %p143_p3 }
   0xa   :  { %p146_p6 = pnand %p145_p5, %p139_p0 }
   0xc   :  { %149 = shalt.err (!%p146_p6)
}
   0xd   :  { %s150_s22 = scalar_lea.vmem %s22_s16, 64  ;;  %p155_p8 = scmp.lt.s32.totalorder %s22_s16, %s22_s16 }
   0xe   :  { %p151_p7 = scmp.ne.s32.totalorder %s22_s16, %s150_s22  ;;  %p156_p9 = scmp.lt.s32.totalorder %s150_s22, %s150_s22 }
  0x10   :  { %p157_p10 = por %p156_p9, %p155_p8 }
  0x12   :  { %p158_p11 = pnand %p157_p10, %p151_p7 }
  0x14   :  { %161 = shalt.err (!%p158_p11)
}
  0x15   :  { %24 = dma.hbm_to_vmem [thread:$0]  %s19_s14, 64, %s22_s16, [#allocation3]  }
  0x16   :  { %173 = dma.done.wait [#allocation3], 64  }
  0x17   :  { %174 = vsyncadd [#allocation3], 4294967232  ;;  %v178_v0 = vmov 0   ;;  %vm37_vm0 = vcmask 125952   ;;  %v28_v1 = vld [vmem:[%s234_s1] sm:$0xf]  ;;  %v31_v12 = vlaneseq }
  0x18   :  { %126 = vset.pattern.permute.xlu1 %v178_v0  ;;  %127 = vset.pattern.permute.xlu0 %v178_v0  ;;  %v29_v2 = vld [vmem:[#allocation2] sm:$0xf]  ;;  %v30_v3 = vld [vmem:[%s233_s0] sm:$0xf]  ;;  %v38_v4 = vsel %vm37_vm0, %v28_v1, -inf  ;;  %vm61_vm3 = vcmask 3072  }
  0x19   :  { %52 = vperm.xlu1 %126, %v30_v3   ;;  %39 = vmax.xlane.f32.xlu0 %v38_v4  ;;  %v72_v5 = vsel %vm37_vm0, %v29_v2, -inf  ;;  %v50_v15 = vand.u32 127, %v31_v12  ;;  %v32_v26 = vshrl.u32 %v31_v12, 7  ;;  %s163_s30 = scalar_lea.hbm %s236_s3, 16 }
  0x1a   :  { %p164_p12 = scmp.ne.s32.totalorder %s236_s3, %s163_s30  ;;  %p167_p13 = scmp.lt.u32.totalorder %s163_s30, %s236_s3 }
  0x1b   :  { %vm36_vm2 = vcmp.lt.s32.totalorder %v32_v26, 4 }
  0x1c   :  { %p169_p0 = pnand %p167_p13, %p164_p12 }
  0x1d   :  { %73 = vmax.xlane.f32.xlu0 %v72_v5 }
  0x98   :  { %v53_v17 = vpop.permute.xlu1 %52 }
  0x99   :  { %vm54_vm1 = vcmp.eq.s32.totalorder %v50_v15, %v53_v17 }
  0xa6   :  { %v40_v6 = vpop.xlane.xlu0 %39 }
  0xa7   :  { %v41_v7 = vsub.f32 %v28_v1, %v40_v6 }
  0xa9   :  { %v42_v8 = vmul.f32 1.442695, %v41_v7  ;;  %v55_v21 = vsel %vm54_vm1, %v41_v7, 0.0 }
  0xaa   :  { %v74_v9 = vpop.xlane.xlu0 %73  ;;  %v56_v22 = vsel %vm37_vm0, %v55_v21, 0.0 }
  0xab   :  { %128 = vpow2.f32 %v42_v8  ;;  %v75_v10 = vsub.f32 %v29_v2, %v74_v9 }
  0xad   :  { %v76_v11 = vmul.f32 1.442695, %v75_v10 }
  0xaf   :  { %130 = vpow2.f32 %v76_v11 }
  0xb5   :  { %v129_v13 = vpop.eup %128 }
  0xb6   :  { %v44_v14 = vsel %vm37_vm0, %v129_v13, 0.0 }
  0xb7   :  { %45 = vadd.xlane.f32.xlu1 %v44_v14 }
  0xb9   :  { %v131_v16 = vpop.eup %130 }
  0xba   :  { %v78_v18 = vsel %vm37_vm0, %v131_v16, 0.0  ;;  %v81_v19 = vmul.f32 %v131_v16, %v75_v10 }
  0xbb   :  { %79 = vadd.xlane.f32.xlu0 %v78_v18 }
  0xbc   :  { %v82_v20 = vsel %vm37_vm0, %v81_v19, 0.0 }
  0xbf   :  { %83 = vadd.xlane.f32.xlu0 %v82_v20 }
  0xc3   :  { %57 = vadd.xlane.f32.xlu0 %v56_v22 }
 0x144   :  { %v46_v23 = vpop.xlane.xlu1 %45 }
 0x145   :  { %132 = vlog2.f32 %v46_v23 }
 0x148   :  { %v80_v24 = vpop.xlane.xlu0 %79 }
 0x149   :  { %134 = vlog2.f32 %v80_v24 }
 0x14a   :  { %136 = vrcp.f32 %v80_v24 }
 0x14c   :  { %v84_v25 = vpop.xlane.xlu0 %83 }
 0x14f   :  { %v133_v27 = vpop.eup %132 }
 0x150   :  { %v48_v28 = vmul.f32 0.6931472, %v133_v27  ;;  %v58_v29 = vpop.xlane.xlu0 %57 }
 0x152   :  { %v59_v30 = vsub.f32 %v48_v28, %v58_v29 }
 0x153   :  { %v135_v31 = vpop.eup %134 }
 0x154   :  { %v137_v32 = vpop.eup %136  ;;  %v86_v33 = vmul.f32 0.6931472, %v135_v31  ;;  %v60_v34 = vsel %vm36_vm2, %v59_v30, 0.0 }
 0x155   :  { %v88_v35 = vmul.f32 %v137_v32, %v84_v25  ;;  %v62_v36 = vsel %vm61_vm3, %v60_v34, 0.0 }
 0x156   :  { %63 = vadd.xlane.f32.xlu0 %v62_v36 }
 0x157   :  { %v89_v37 = vsub.f32 %v86_v33, %v88_v35 }
 0x159   :  { %v90_v38 = vsel %vm36_vm2, %v89_v37, 0.0 }
 0x15a   :  { %v91_v39 = vsel %vm61_vm3, %v90_v38, 0.0 }
 0x15b   :  { %92 = vadd.xlane.f32.xlu0 %v91_v39 }
 0x1e3   :  { %v64_v40 = vpop.xlane.xlu0 %63 }
 0x1e4   :  { %v65_v41 = vrot.slane %v64_v40, 4 }
 0x1e6   :  { %v66_v42 = vadd.f32 %v65_v41, %v64_v40 }
 0x1e8   :  { %v67_v43 = vrot.slane %v66_v42, 2  ;;  %v93_v44 = vpop.xlane.xlu0 %92 }
 0x1e9   :  { %v94_v45 = vrot.slane %v93_v44, 4 }
 0x1ea   :  { %v68_v46 = vadd.f32 %v67_v43, %v66_v42 }
 0x1eb   :  { %v95_v47 = vadd.f32 %v94_v45, %v93_v44 }
 0x1ec   :  { %v69_v48 = vrot.slane %v68_v46, 1 }
 0x1ed   :  { %v96_v49 = vrot.slane %v95_v47, 2 }
 0x1ee   :  { %v70_v50 = vadd.f32 %v69_v48, %v68_v46 }
 0x1ef   :  { %v97_v51 = vadd.f32 %v96_v49, %v95_v47 }
 0x1f0   :  { %119 = vpush %v70_v50 }
 0x1f1   :  { %v98_v52 = vrot.slane %v97_v51, 1 }
 0x1f3   :  { %v99_v53 = vadd.f32 %v98_v52, %v97_v51 }
 0x1f5   :  { %121 = vpush %v99_v53 }
 0x221   :  { %s120_s0 = spop %119 }
 0x226   :  { %s122_s1 = spop %121 }
 0x227   :  { %s101_s26 = smul.f32 0.1, %s122_s1 }
 0x229   :  { %s102_s27 = sadd.f32 %s120_s0, %s101_s26 }
 0x22b   :  { %104 = sst [smem:[#allocation5]] %s102_s27 }
 0x22c   :  { %172 = shalt.err (!%p169_p0)
}
 0x22d   :  { %s179_s8 = smov [#allocation5]  }
 0x22e   :  { %112 = dma.smem_to_hbm %s179_s8, 16, %s236_s3, [#allocation4]  }
 0x22f   :  { %175 = dma.done.wait [#allocation4], 16  }
 0x230   :  { %176 = vsyncadd [#allocation4], 4294967280 }
 0x231   :  { %116 = sfence }
 0x232   :  { %117 = vsyncpa [#allocation3], 1 }
 0x233   :  { %118 = vsyncpa [#allocation4], 1 }

</bundles_post_ra>
